<compile_context>
chip_gen: v7x
topology: tpu7x:2x2x1
jax: 0.10.0
libtpu: 0.0.40
codegen_flags: <defaults>
</compile_context>

<pallas_src>
import jax
import jax.numpy as jnp
from jax import lax
from jax.experimental import pallas as pl
from jax.experimental.pallas import tpu as pltpu


# ---------------------------------------------------------------- kernel ----

def _pool_k3_s2_p1_pairs(p):
    """MaxPool1d(kernel=3, stride=2, padding=1) on a flat 'padded' slab.

    p: (M, C) with M = B * Lpad (Lpad even).  Per-sample row layout:
    p[0] = 0 (left pad), p[1:1+L] = post-ReLU activations (>= 0), remaining
    rows 0 / don't-care.  Returns (M // 2, C) where row i = max(p[2i], p[2i+1],
    p[2i+2]); the last row of each sample's group is junk (reads across the
    sample boundary) and is never consumed by a valid downstream row.
    """
    m, c = p.shape
    # q[j] = max(p[j], p[j+1])  -- one XLU sublane roll over the whole slab
    q = jnp.maximum(p, pltpu.roll(p, shift=m - 1, axis=0))
    r = q.reshape(m // 2, 2, c)
    return jnp.maximum(r[:, 0, :], r[:, 1, :])


def _cnn_kernel(x_ref, w1_ref, t1_ref, w2_ref, t2_ref, o_ref):
    B, L0, Cin = x_ref.shape
    C2 = w2_ref.shape[2]
    Lh = L0 // 2                       # rows/sample after pool1 (incl. 1 junk row)
    Lo = L0 // 4                       # rows/sample after pool2 (incl. 1 junk row)
    M1 = B * L0
    M2 = B * Lh

    # -------- layer 1: conv1 (+bn1 folded) -> ReLU -> maxpool(3,2,1) --------
    x = x_ref[...].reshape(M1, Cin)                     # free relabel (L0 % 8 == 0)
    prev = pltpu.roll(x, shift=1, axis=0)               # row j = x[j-1]
    nxt = pltpu.roll(x, shift=M1 - 1, axis=0)           # row j = x[j+1]
    # single 12-lane im2col slab -> ONE MXU dot, M = B*L0, K = 3*Cin
    xt = jnp.concatenate([prev, x, nxt], axis=1)        # (M1, 3*Cin), one lane tile
    y1 = jnp.dot(xt, w1_ref[...], preferred_element_type=jnp.float32)
    y1 = jnp.maximum(y1 + t1_ref[...], 0.0)

    # Row j of each sample's L0-group holds conv output at position j-1; valid
    # j in [1, L0-2].  Masked rows (j = 0, L0-1) are exactly the rows that read
    # across sample boundaries and they double as the MaxPool zero padding.
    j1 = lax.broadcasted_iota(jnp.int32, (B, L0, 1), 1).reshape(M1, 1)
    p1 = jnp.where((j1 >= 1) & (j1 <= L0 - 2), y1, 0.0)
    h1 = _pool_k3_s2_p1_pairs(p1)                        # (M2, C1)

    # -------- layer 2: conv2 (+bn2 folded) -> ReLU -> maxpool(3,2,1) --------
    prev2 = pltpu.roll(h1, shift=1, axis=0)
    nxt2 = pltpu.roll(h1, shift=M2 - 1, axis=0)
    # three K=64 dots on shifted slabs instead of one 192-lane im2col concat
    y2 = jnp.dot(prev2, w2_ref[0], preferred_element_type=jnp.float32)
    y2 = y2 + jnp.dot(h1, w2_ref[1], preferred_element_type=jnp.float32)
    y2 = y2 + jnp.dot(nxt2, w2_ref[2], preferred_element_type=jnp.float32)
    y2 = jnp.maximum(y2 + t2_ref[...], 0.0)

    # valid conv2 rows: j in [1, Lh-3]   (conv2 length = pool1_len - 2 = Lh - 3)
    j2 = lax.broadcasted_iota(jnp.int32, (B, Lh, 1), 1).reshape(M2, 1)
    p2 = jnp.where((j2 >= 1) & (j2 <= Lh - 3), y2, 0.0)
    out = _pool_k3_s2_p1_pairs(p2)                       # (B*Lo, C2)

    # single lane-dense, sublane-aligned block store (Lo = 16 rows/sample; the
    # real P2 = 15 rows are sliced in the wrapper).
    o_ref[...] = out.reshape(B, Lo, C2).astype(o_ref.dtype)


# --------------------------------------------------------------- wrapper ----

def cnn_net_forward(x_nlc, w1, t1, w2, t2, *, block_b=64):
    """x_nlc: (N, L0, Cin).  w1: (3*Cin, C1) tap-major im2col matrix with the
    BN1 scale folded in; w2: (3, C1, C2) per-tap matrices with BN2 scale folded
    in; t1/t2: (1, C) BN shift (incl. conv bias).  Returns (N, P2, C2) (NLC)."""
    N, L0, Cin = x_nlc.shape
    assert L0 % 4 == 0, "kernel assumes the sequence length is a multiple of 4"
    C1 = w1.shape[1]
    C2 = w2.shape[2]
    P1 = (L0 - 2) // 2
    P2 = (P1 - 2 - 1) // 2 + 1          # = L0 // 4 - 1
    Lo = L0 // 4

    # Batch block size: large enough to amortize the ~0.35us/grid-step overhead
    # and fill MXU rows; small enough that the lane-padded (B, L0, Cin) input
    # block plus pooling temps stay well inside scoped VMEM (v7x: 64 MiB
    # physical); and chosen so the grid has >= 2 steps whenever N >= 2 so both
    # v7x TensorCores get work.
    if N <= 1:
        B = 1
    else:
        B = max(1, min(block_b, (N + 1) // 2))
    n_pad = (-N) % B
    if n_pad:
        x_nlc = jnp.concatenate(
            [x_nlc, jnp.zeros((n_pad, L0, Cin), x_nlc.dtype)], axis=0)
    Np = N + n_pad

    out = pl.pallas_call(
        _cnn_kernel,
        out_shape=jax.ShapeDtypeStruct((Np, Lo, C2), jnp.float32),
        grid_spec=pltpu.PrefetchScalarGridSpec(
            num_scalar_prefetch=0,
            grid=(Np // B,),
            in_specs=[
                pl.BlockSpec((B, L0, Cin), lambda n: (n, 0, 0)),
                # grid-invariant parameters (index_map constant, fetched once;
                # ~200 KiB total so default double-buffering is harmless —
                # pl.Buffered(1) considered per review but skipped for safety).
                pl.BlockSpec((3 * Cin, C1), lambda n: (0, 0)),
                pl.BlockSpec((1, C1), lambda n: (0, 0)),
                pl.BlockSpec((3, C1, C2), lambda n: (0, 0, 0)),
                pl.BlockSpec((1, C2), lambda n: (0, 0)),
            ],
            out_specs=pl.BlockSpec((B, Lo, C2), lambda n: (n, 0, 0)),
        ),
        compiler_params=pltpu.CompilerParams(
            dimension_semantics=("parallel",),     # batch blocks independent
            vmem_limit_bytes=40 * 1024 * 1024,
        ),
    )(x_nlc, w1, t1, w2, t2)
    # drop padded samples and the per-sample junk pool row (P2 padded to L0//4
    # so the kernel's store is sublane-aligned and unmasked).
    return out[:N, :P2, :]


# ------------------------------------------------------------- reference ----

def _ref_block(x_ncl, w_oik, b, gamma, beta, mean, var, eps=1e-5):
    """Pure-JAX reference for one conv -> bn(eval) -> relu -> maxpool block."""
    y = lax.conv_general_dilated(
        x_ncl, w_oik, window_strides=(1,), padding="VALID",
        dimension_numbers=("NCH", "OIH", "NCH"))
    y = y + b[None, :, None]
    y = (y - mean[None, :, None]) / jnp.sqrt(var[None, :, None] + eps)
    y = y * gamma[None, :, None] + beta[None, :, None]
    y = jnp.maximum(y, 0.0)
    y = lax.reduce_window(y, -jnp.inf, lax.max,
                          window_dimensions=(1, 1, 3),
                          window_strides=(1, 1, 2),
                          padding=((0, 0), (0, 0), (1, 1)))
    return y


# ------------------------------------------------------------------ main ----

if __name__ == "__main__":
    N, Cin, L0 = 2, 4, 64           # small shapes: batch=2, in_planes=4, seq=64
    C1, C2 = 64, 128                # channel sizes fixed by the module
    eps = 1e-5

    key = jax.random.PRNGKey(0)
    ks = jax.random.split(key, 13)

    # deterministic synthetic parameters (PyTorch layouts)
    w1_oik = 0.1 * jax.random.normal(ks[0], (C1, Cin, 3), jnp.float32)
    b1 = 0.1 * jax.random.normal(ks[1], (C1,), jnp.float32)
    g1 = 1.0 + 0.1 * jax.random.normal(ks[2], (C1,), jnp.float32)
    be1 = 0.1 * jax.random.normal(ks[3], (C1,), jnp.float32)
    m1 = 0.1 * jax.random.normal(ks[4], (C1,), jnp.float32)
    v1 = 0.5 + jnp.abs(jax.random.normal(ks[5], (C1,), jnp.float32))

    w2_oik = 0.1 * jax.random.normal(ks[6], (C2, C1, 3), jnp.float32)
    b2 = 0.1 * jax.random.normal(ks[7], (C2,), jnp.float32)
    g2 = 1.0 + 0.1 * jax.random.normal(ks[8], (C2,), jnp.float32)
    be2 = 0.1 * jax.random.normal(ks[9], (C2,), jnp.float32)
    m2 = 0.1 * jax.random.normal(ks[10], (C2,), jnp.float32)
    v2 = 0.5 + jnp.abs(jax.random.normal(ks[11], (C2,), jnp.float32))

    x_ncl = jax.random.normal(ks[12], (N, Cin, L0), jnp.float32)

    # fold BN (eval mode): scale into the conv weights, shift (+conv bias)
    # into a per-channel add.
    s1 = g1 / jnp.sqrt(v1 + eps)
    t1 = be1 + s1 * (b1 - m1)
    s2 = g2 / jnp.sqrt(v2 + eps)
    t2 = be2 + s2 * (b2 - m2)

    # kernel-layout weights:
    #   conv1: (3*Cin, C1) tap-major im2col matrix (rows = [tap0 ch, tap1 ch, tap2 ch])
    #   conv2: (3, C1, C2), one (C1, C2) matrix per tap
    w1_k = (jnp.transpose(w1_oik, (2, 1, 0)) * s1[None, None, :]).reshape(3 * Cin, C1)
    w2_k = jnp.transpose(w2_oik, (2, 1, 0)) * s2[None, None, :]

    x_nlc = jnp.transpose(x_ncl, (0, 2, 1))                    # (N, L0, Cin)

    out = cnn_net_forward(x_nlc,
                          w1_k, t1.reshape(1, C1),
                          w2_k, t2.reshape(1, C2))
    out = jax.block_until_ready(out)                           # (N, 15, 128)

    # pure-JAX reference (NCL, exactly mirrors the PyTorch forward)
    ref = _ref_block(x_ncl, w1_oik, b1, g1, be1, m1, v1, eps)
    ref = _ref_block(ref, w2_oik, b2, g2, be2, m2, v2, eps)    # (N, 128, 15)

    assert out.shape == (N, 15, C2), out.shape
    err = jnp.max(jnp.abs(jnp.transpose(out, (0, 2, 1)) - ref))
    assert float(err) < 1e-3, f"max abs err {float(err)}"

    print("KERNEL_OK")
</pallas_src>

<mosaic_0001>
module attributes {stable_mosaic.version = 11 : i64} {
  func.func @_cnn_kernel(%arg0: i32, %arg1: memref<1x64x4xf32, #tpu.memory_space<vmem>>, %arg2: memref<12x64xf32, #tpu.memory_space<vmem>>, %arg3: memref<1x64xf32, #tpu.memory_space<vmem>>, %arg4: memref<3x64x128xf32, #tpu.memory_space<vmem>>, %arg5: memref<1x128xf32, #tpu.memory_space<vmem>>, %arg6: memref<1x16x128xf32, #tpu.memory_space<vmem>>) attributes {dimension_semantics = [#tpu.dimension_semantics<parallel>], iteration_bounds = array<i64: 2>, scalar_prefetch = 0 : i64, scratch_operands = 0 : i64, tpu.core_type = #tpu.core_type<tc>, window_params = [{transform_indices = @transform_0, window_bounds = array<i64: 1, 64, 4>}, {pipeline_mode = #tpu.pipeline_mode<synchronous>, transform_indices = @transform_1, window_bounds = array<i64: 12, 64>}, {pipeline_mode = #tpu.pipeline_mode<synchronous>, transform_indices = @transform_2, window_bounds = array<i64: 1, 64>}, {pipeline_mode = #tpu.pipeline_mode<synchronous>, transform_indices = @transform_3, window_bounds = array<i64: 3, 64, 128>}, {pipeline_mode = #tpu.pipeline_mode<synchronous>, transform_indices = @transform_4, window_bounds = array<i64: 1, 128>}, {transform_indices = @transform_5, window_bounds = array<i64: 1, 16, 128>}]} {
    %c0 = arith.constant 0 : index
    %c0_0 = arith.constant 0 : index
    %c0_1 = arith.constant 0 : index
    %0 = vector.load %arg1[%c0, %c0_0, %c0_1] : memref<1x64x4xf32, #tpu.memory_space<vmem>>, vector<1x64x4xf32>
    %1 = vector.shape_cast %0 : vector<1x64x4xf32> to vector<64x4xf32>
    %c1_i32 = arith.constant 1 : i32
    %2 = tpu.dynamic_rotate %1 by %c1_i32 dim 0 : vector<64x4xf32>, i32 -> vector<64x4xf32>
    %c63_i32 = arith.constant 63 : i32
    %3 = tpu.dynamic_rotate %1 by %c63_i32 dim 0 : vector<64x4xf32>, i32 -> vector<64x4xf32>
    %4 = tpu.concatenate %2, %1, %3 in 1 : vector<64x4xf32>, vector<64x4xf32>, vector<64x4xf32> -> vector<64x12xf32>
    %c0_2 = arith.constant 0 : index
    %c0_3 = arith.constant 0 : index
    %5 = vector.load %arg2[%c0_2, %c0_3] : memref<12x64xf32, #tpu.memory_space<vmem>>, vector<12x64xf32>
    %cst = arith.constant dense<0.000000e+00> : vector<64x64xf32>
    %6 = tpu.matmul %4, %5, %cst {dimension_numbers = #tpu.dot_dimension_numbers<[1], [0], [0], [1], [0, 0, 1, 1], [], []>} : vector<64x12xf32>, vector<12x64xf32>, vector<64x64xf32> -> vector<64x64xf32>
    %c0_4 = arith.constant 0 : index
    %c0_5 = arith.constant 0 : index
    %7 = vector.load %arg3[%c0_4, %c0_5] : memref<1x64xf32, #tpu.memory_space<vmem>>, vector<1x64xf32>
    %8 = vector.broadcast %7 : vector<1x64xf32> to vector<64x64xf32>
    %9 = arith.addf %6, %8 : vector<64x64xf32>
    %cst_6 = arith.constant 0.000000e+00 : f32
    %10 = vector.broadcast %cst_6 : f32 to vector<64x64xf32>
    %11 = arith.maximumf %9, %10 : vector<64x64xf32>
    %12 = tpu.iota {dimensions = array<i32: 1>} : vector<1x64x1xi32>
    %13 = vector.shape_cast %12 : vector<1x64x1xi32> to vector<64x1xi32>
    %c1_i32_7 = arith.constant 1 : i32
    %14 = vector.broadcast %c1_i32_7 : i32 to vector<64x1xi32>
    %15 = arith.cmpi sge, %13, %14 : vector<64x1xi32>
    %c62_i32 = arith.constant 62 : i32
    %16 = vector.broadcast %c62_i32 : i32 to vector<64x1xi32>
    %17 = arith.cmpi sle, %13, %16 : vector<64x1xi32>
    %18 = arith.andi %15, %17 : vector<64x1xi1>
    %cst_8 = arith.constant 0.000000e+00 : f32
    %19 = vector.shape_cast %18 : vector<64x1xi1> to vector<64x1xi1>
    %20 = vector.broadcast %19 : vector<64x1xi1> to vector<64x64xi1>
    %21 = vector.broadcast %cst_8 : f32 to vector<64x64xf32>
    %22 = arith.select %20, %11, %21 : vector<64x64xi1>, vector<64x64xf32>
    %c63_i32_9 = arith.constant 63 : i32
    %23 = tpu.dynamic_rotate %22 by %c63_i32_9 dim 0 : vector<64x64xf32>, i32 -> vector<64x64xf32>
    %24 = arith.maximumf %22, %23 : vector<64x64xf32>
    %25 = vector.shape_cast %24 : vector<64x64xf32> to vector<32x2x64xf32>
    %26 = vector.extract_strided_slice %25 {offsets = [0, 0, 0], sizes = [32, 1, 64], strides = [1, 1, 1]} : vector<32x2x64xf32> to vector<32x1x64xf32>
    %27 = vector.shape_cast %26 : vector<32x1x64xf32> to vector<32x64xf32>
    %28 = vector.extract_strided_slice %25 {offsets = [0, 1, 0], sizes = [32, 1, 64], strides = [1, 1, 1]} : vector<32x2x64xf32> to vector<32x1x64xf32>
    %29 = vector.shape_cast %28 : vector<32x1x64xf32> to vector<32x64xf32>
    %30 = arith.maximumf %27, %29 : vector<32x64xf32>
    %c1_i32_10 = arith.constant 1 : i32
    %31 = tpu.dynamic_rotate %30 by %c1_i32_10 dim 0 : vector<32x64xf32>, i32 -> vector<32x64xf32>
    %c31_i32 = arith.constant 31 : i32
    %32 = tpu.dynamic_rotate %30 by %c31_i32 dim 0 : vector<32x64xf32>, i32 -> vector<32x64xf32>
    %c0_11 = arith.constant 0 : index
    %c0_12 = arith.constant 0 : index
    %c0_13 = arith.constant 0 : index
    %33 = vector.load %arg4[%c0_11, %c0_12, %c0_13] : memref<3x64x128xf32, #tpu.memory_space<vmem>>, vector<1x64x128xf32>
    %34 = vector.shape_cast %33 : vector<1x64x128xf32> to vector<64x128xf32>
    %cst_14 = arith.constant dense<0.000000e+00> : vector<32x128xf32>
    %35 = tpu.matmul %31, %34, %cst_14 {dimension_numbers = #tpu.dot_dimension_numbers<[1], [0], [0], [1], [0, 0, 1, 1], [], []>} : vector<32x64xf32>, vector<64x128xf32>, vector<32x128xf32> -> vector<32x128xf32>
    %c1 = arith.constant 1 : index
    %c0_15 = arith.constant 0 : index
    %c0_16 = arith.constant 0 : index
    %36 = vector.load %arg4[%c1, %c0_15, %c0_16] : memref<3x64x128xf32, #tpu.memory_space<vmem>>, vector<1x64x128xf32>
    %37 = vector.shape_cast %36 : vector<1x64x128xf32> to vector<64x128xf32>
    %cst_17 = arith.constant dense<0.000000e+00> : vector<32x128xf32>
    %38 = tpu.matmul %30, %37, %cst_17 {dimension_numbers = #tpu.dot_dimension_numbers<[1], [0], [0], [1], [0, 0, 1, 1], [], []>} : vector<32x64xf32>, vector<64x128xf32>, vector<32x128xf32> -> vector<32x128xf32>
    %39 = arith.addf %35, %38 : vector<32x128xf32>
    %c2 = arith.constant 2 : index
    %c0_18 = arith.constant 0 : index
    %c0_19 = arith.constant 0 : index
    %40 = vector.load %arg4[%c2, %c0_18, %c0_19] : memref<3x64x128xf32, #tpu.memory_space<vmem>>, vector<1x64x128xf32>
    %41 = vector.shape_cast %40 : vector<1x64x128xf32> to vector<64x128xf32>
    %cst_20 = arith.constant dense<0.000000e+00> : vector<32x128xf32>
    %42 = tpu.matmul %32, %41, %cst_20 {dimension_numbers = #tpu.dot_dimension_numbers<[1], [0], [0], [1], [0, 0, 1, 1], [], []>} : vector<32x64xf32>, vector<64x128xf32>, vector<32x128xf32> -> vector<32x128xf32>
    %43 = arith.addf %39, %42 : vector<32x128xf32>
    %c0_21 = arith.constant 0 : index
    %c0_22 = arith.constant 0 : index
    %44 = vector.load %arg5[%c0_21, %c0_22] : memref<1x128xf32, #tpu.memory_space<vmem>>, vector<1x128xf32>
    %45 = vector.broadcast %44 : vector<1x128xf32> to vector<32x128xf32>
    %46 = arith.addf %43, %45 : vector<32x128xf32>
    %cst_23 = arith.constant 0.000000e+00 : f32
    %47 = vector.broadcast %cst_23 : f32 to vector<32x128xf32>
    %48 = arith.maximumf %46, %47 : vector<32x128xf32>
    %49 = tpu.iota {dimensions = array<i32: 1>} : vector<1x32x1xi32>
    %50 = vector.shape_cast %49 : vector<1x32x1xi32> to vector<32x1xi32>
    %c1_i32_24 = arith.constant 1 : i32
    %51 = vector.broadcast %c1_i32_24 : i32 to vector<32x1xi32>
    %52 = arith.cmpi sge, %50, %51 : vector<32x1xi32>
    %c29_i32 = arith.constant 29 : i32
    %53 = vector.broadcast %c29_i32 : i32 to vector<32x1xi32>
    %54 = arith.cmpi sle, %50, %53 : vector<32x1xi32>
    %55 = arith.andi %52, %54 : vector<32x1xi1>
    %cst_25 = arith.constant 0.000000e+00 : f32
    %56 = vector.shape_cast %55 : vector<32x1xi1> to vector<32x1xi1>
    %57 = vector.broadcast %56 : vector<32x1xi1> to vector<32x128xi1>
    %58 = vector.broadcast %cst_25 : f32 to vector<32x128xf32>
    %59 = arith.select %57, %48, %58 : vector<32x128xi1>, vector<32x128xf32>
    %c31_i32_26 = arith.constant 31 : i32
    %60 = tpu.dynamic_rotate %59 by %c31_i32_26 dim 0 : vector<32x128xf32>, i32 -> vector<32x128xf32>
    %61 = arith.maximumf %59, %60 : vector<32x128xf32>
    %62 = vector.shape_cast %61 : vector<32x128xf32> to vector<16x2x128xf32>
    %63 = vector.extract_strided_slice %62 {offsets = [0, 0, 0], sizes = [16, 1, 128], strides = [1, 1, 1]} : vector<16x2x128xf32> to vector<16x1x128xf32>
    %64 = vector.shape_cast %63 : vector<16x1x128xf32> to vector<16x128xf32>
    %65 = vector.extract_strided_slice %62 {offsets = [0, 1, 0], sizes = [16, 1, 128], strides = [1, 1, 1]} : vector<16x2x128xf32> to vector<16x1x128xf32>
    %66 = vector.shape_cast %65 : vector<16x1x128xf32> to vector<16x128xf32>
    %67 = arith.maximumf %64, %66 : vector<16x128xf32>
    %68 = vector.shape_cast %67 : vector<16x128xf32> to vector<1x16x128xf32>
    %c0_27 = arith.constant 0 : index
    %c0_28 = arith.constant 0 : index
    %c0_29 = arith.constant 0 : index
    %69 = vector.load %arg6[%c0_27, %c0_28, %c0_29] : memref<1x16x128xf32, #tpu.memory_space<vmem>>, vector<1x16x128xf32>
    tpu.vector_store %arg6[%c0_27, %c0_28, %c0_29], %68 {strides = array<i32>} : memref<1x16x128xf32, #tpu.memory_space<vmem>>, vector<1x16x128xf32>,
    return
  }
  func.func @transform_0(%arg0: i32) -> (i32, i32, i32) {
    %c0_i32 = arith.constant 0 : i32
    %c0_i32_0 = arith.constant 0 : i32
    %c0_i32_1 = arith.constant 0 : i32
    return %arg0, %c0_i32, %c0_i32_0 : i32, i32, i32
  }
  func.func @transform_1(%arg0: i32) -> (i32, i32) {
    %c0_i32 = arith.constant 0 : i32
    %c0_i32_0 = arith.constant 0 : i32
    %c0_i32_1 = arith.constant 0 : i32
    return %c0_i32, %c0_i32_0 : i32, i32
  }
  func.func @transform_2(%arg0: i32) -> (i32, i32) {
    %c0_i32 = arith.constant 0 : i32
    %c0_i32_0 = arith.constant 0 : i32
    %c0_i32_1 = arith.constant 0 : i32
    return %c0_i32, %c0_i32_0 : i32, i32
  }
  func.func @transform_3(%arg0: i32) -> (i32, i32, i32) {
    %c0_i32 = arith.constant 0 : i32
    %c0_i32_0 = arith.constant 0 : i32
    %c0_i32_1 = arith.constant 0 : i32
    %c0_i32_2 = arith.constant 0 : i32
    return %c0_i32, %c0_i32_0, %c0_i32_1 : i32, i32, i32
  }
  func.func @transform_4(%arg0: i32) -> (i32, i32) {
    %c0_i32 = arith.constant 0 : i32
    %c0_i32_0 = arith.constant 0 : i32
    %c0_i32_1 = arith.constant 0 : i32
    return %c0_i32, %c0_i32_0 : i32, i32
  }
  func.func @transform_5(%arg0: i32) -> (i32, i32, i32) {
    %c0_i32 = arith.constant 0 : i32
    %c0_i32_0 = arith.constant 0 : i32
    %c0_i32_1 = arith.constant 0 : i32
    return %arg0, %c0_i32, %c0_i32_0 : i32, i32, i32
  }
}

</mosaic_0001>

<bundles_post_ra>
// kernel: tpu_custom_call.1
= control target key start
LH: loop header
LB: loop body
LE: loop exit
PB: predicated region body
PF: predicated region fallthrough
CT: control target
= control target key end

     0   :  { %10 = vsyncpa [#allocation3], 0  ;;  %s2860_s0 = inlined_call_operand.vmem [shape: f32[2,64,4], index: 0, kind: input, shape index: {}]   ;;  %s2861_s1 = inlined_call_operand.vmem [shape: f32[12,64], index: 1, kind: input, shape index: {}]   ;;  %s2862_s2 = inlined_call_operand.vmem [shape: f32[1,64], index: 2, kind: input, shape index: {}]   ;;  %s2863_s3 = inlined_call_operand.hbm [shape: f32[3,64,128], index: 3, kind: input, shape index: {}]   ;;  %s2864_s4 = inlined_call_operand.vmem [shape: f32[1,128], index: 4, kind: input, shape index: {}]   ;;  %s2865_s5 = inlined_call_operand.hbm [shape: f32[2,16,128], index: 5, kind: output, shape index: {}]  }
   0x1   :  { %11 = vsyncpa [#allocation4], 0 }
   0x2   :  { %13 = vsyncpa [#allocation4 + $0x1], 0  ;;  %s2285_s18 = smov 0   ;;  %s2287_s19 = smov 0  }
   0x3   :  { %s2289_s20 = smov 0   ;;  %s2291_s21 = smov 0  }
   0x4 LB: > { %s2306_s22 = sadd.s32 4294967295, %s2244_s21   ;;  %s1816_s23 = sadd.s32 4294967294, %s2244_s21   ;;  %s2244_s21 = sphi %s2291_s21, %s2883_s21   ;;  %s2240_s20 = sphi %s2289_s20, %s2882_s20   ;;  %s2236_s19 = sphi %s2287_s19, %s2881_s19   ;;  %s2232_s18 = sphi %s2285_s18, %s2880_s18  }
   0x5   : > { %s2310_s24 = sadd.s32 1, %s2244_s21   ;;  %s136_s25 = sadd.s32 1, %s2240_s20 }
   0x6   : > { %s133_s26 = ssub.s32 %s2244_s21, %s2310_s24  ;;  %p146_p0 = scmp.ne.s32.totalorder %s2240_s20, %s2236_s19 }
   0x7   : > { %p134_p1 = scmp.eq.s32.totalorder %s133_s26, 0  ;;  %p147_p2 = scmp.eq.s32.totalorder %s2306_s22, 1 }
   0x8   : > { %p152_p3 = scmp.ne.s32.totalorder %s2236_s19, %s2232_s18  ;;  %p153_p4 = scmp.eq.s32.totalorder %s1816_s23, 1 }
   0x9   : > { %s2321_s27 = scalar_select %p134_p1, %s2240_s20, %s136_s25  }
   0xa   : > { %p2323_p5 = por %p147_p2, %p146_p0  ;;  %p2327_p6 = por %p153_p4, %p152_p3 }
   0xb   : > { %p1817_p7 = scmp.ge.s32.totalorder %s2244_s21, 1  ;;  %p160_p8 = scmp.lt.s32.totalorder %s2244_s21, 3 }
   0xc   : > { %s2869_s28 = scalar_select %p2323_p5, 1, 0 }
   0xd   : > { %s2870_s29 = scalar_select %p2327_p6, 1, 0 }
   0xe   : > { %p2866_p9 = scmp.eq.s32.totalorder %s2306_s22, 0  ;;  %p2334_p10 = pnand %p1817_p7, %p160_p8 }
   0xf   : > { %s2246_s6 = smov [#allocation2]   ;;  %s2150_s11 = scalar_lea.hbm %s2863_s3, 3072 }
  0x10   : > { %s2871_s30 = scalar_select %p2334_p10, 1, 0 }
  0x11   : > { %s178_s7 = sshll.u32 %s2246_s6, 4  ;;  %p2099_p11 = pneg %p2334_p10  ;;  %s179_s7 = int_to_ptr.vmem [resolvable:$true] %s178_s7 }
  0x12   : > { %p2151_p13 = scmp.ne.s32.totalorder %s2863_s3, %s2150_s11  ;;  %p2157_p3 = scmp.lt.u32.totalorder %s2150_s11, %s2863_s3 }
  0x13   : > { %p2342_p12 = pnand %p2866_p9, %p2099_p11 }
  0x15   : > { %p2152_p0 = pneg %p2342_p12 }
  0x17   : > { %p2153_p1 = pnand %p2152_p0, %p2151_p13 }
  0x19   : > { %p2154_p2 = pneg %p2153_p1 }
  0x1b   : > { %p2159_p4 = pnand %p2157_p3, %p2154_p2 }
  0x1d   : > { %2162 = shalt.err (!%p2159_p4)
}
  0x1e   : > { %s2163_s16 = scalar_lea.vmem %s179_s7, 3072  ;;  %p2171_p9 = scmp.lt.s32.totalorder %s179_s7, %s179_s7 }
  0x1f   : > { %p2164_p7 = scmp.ne.s32.totalorder %s179_s7, %s2163_s16  ;;  %p2172_p6 = scmp.lt.s32.totalorder %s2163_s16, %s2163_s16 }
  0x21   : > { %p2166_p8 = pnand %p2164_p7, %p2152_p0  ;;  %p2173_p5 = por %p2172_p6, %p2171_p9 }
  0x23   : > { %p2167_p11 = pneg %p2166_p8 }
  0x25   : > { %p2174_p10 = pnand %p2173_p5, %p2167_p11 }
  0x27   : > { %2177 = shalt.err (!%p2174_p10)
}
  0x28   : > { %s2247_s17 = smov 128   ;;  %s2248_s23 = smov 8  }
  0x29   : > { %2102 = dma.hbm_to_vmem [thread:$0]  (!%p2342_p12), %s2863_s3, 3072, %s179_s7, [#allocation3], %s2247_s17, %s2247_s17, %s2248_s23  }
  0x2a   : > { %p2873_p13 = scmp.ne.s32.totalorder %s2871_s30, 0 }
  0x2b   : > { %p2874_p1 = scmp.eq.s32.totalorder (!%p2873_p13), %s2306_s22, 0 }
  0x2c   : > { %205 = sbr.rel (%p2873_p13) target bundleno = 744 (0x2e8), region = 40 }
  0x33   : > { %2223 = dma.done.wait (%p2874_p1), [#allocation3], 3072   ;;  %p2875_p0 = pmov %p2874_p1 }
  0x34   : > { %p233_p5 = scmp.lt.s32.totalorder %s2306_s22, 1  ;;  %v254_v0 = vlaneseq  ;;  %vm398_vm0 = vcmask 1043456   ;;  %s2249_s30 = smov 4   ;;  %v364_v15 = vld [vmem:[%s2861_s1] sm:$0xff]  ;;  %v365_v19 = vld [vmem:[%s2861_s1 + $0x8] sm:$0xf] }
  0x35   : > { %2225 = vsyncadd (%p2875_p0), [#allocation3], 4294964224  ;;  %s2250_s15 = smov 8   ;;  %vm2251_vm3 = vmmov 1   ;;  %v2031_v28 = vpack.c.bf16 %v365_v19, %v364_v15  ;;  %vm346_vm5 = vcmask 31744   ;;  %vm355_vm6 = vcmask 64512  }
  0x36   : > { %s234_s6 = scalar_select %p233_p5, %s2306_s22, 1  ;;  %v2370_v1 = vshrl.u32 %v254_v0, 7  ;;  %vm2406_vm4 = vmpackc.low %vm398_vm0, %vm2251_vm3  ;;  %vm373_vm7 = vcmask 97280   ;;  %v1122_v15 = vld [vmem:[#allocation2 + $0x40] sm:$0xff]  ;;  %v1125_v19 = vld [vmem:[#allocation2 + $0x58] sm:$0xff]  ;;  %vm1058_vm10 = vcmask 1041409  }
  0x37   : > { %2033 = vmatprep.subr.msk.bf16.mxu0 %vm2406_vm4, %v2031_v28  ;;  %v1128_v24 = vld [vmem:[#allocation2 + $0x70] sm:$0xff]  ;;  %vm1060_vm11 = vcmask 1042434   ;;  %vm1062_vm12 = vcmask 1043459   ;;  %vm1064_vm13 = vcmask 1044484   ;;  %vm1066_vm14 = vcmask 1045509   ;;  %s230_s26 = sand.u32 1, %s2236_s19  }
  0x38   : > { %s1901_s9 = sshll.u32 %s234_s6, 6  ;;  %vm273_vm1 = vcmp.lt.s32.totalorder %v2370_v1, 7  ;;  %vm256_vm2 = vcmp.lt.s32.totalorder %v2370_v1, 1  ;;  %2036 = vmatpush3.bf16.msk.msra.mxu0 %vm2406_vm4, %v2031_v28  ;;  %v1114_v28 = vld [vmem:[#allocation2 + $0x8] sm:$0xff]  ;;  %vm522_vm8 = vcmp.ge.s32.totalorder %v2370_v1, 1  ;;  %vm1068_vm15 = vcmask 1046534  }
  0x39   : > { %s2375_s7 = scalar_lea.vmem %s2860_s0, %s1901_s9  ;;  %vm1070_vm0 = vcmask 1047559   ;;  %vm1130_vm3 = vcmask 523264   ;;  %s1822_s6 = sshll.u32 %s230_s26, 4 }
  0x3a   : > { %v241_v2 = vld [vmem:[%s2375_s7 + $0x18] sm:$0xff]  ;;  %v2379_v3 = vld [vmem:[%s2375_s7] sm:$0xff]  ;;  %v239_v4 = vld [vmem:[%s2375_s7 + $0x8] sm:$0xff]  ;;  %s1902_s9 = sshll.u32 %s2306_s22, 8  ;;  %s232_s8 = scalar_lea.vmem [#allocation5], %s1822_s6 }
  0x3b   : > { %296 = vrot.lane.b32.xlu1 %v241_v2, %s2249_s30  ;;  %v249_v5 = vrot.slane %v241_v2, 7  ;;  %290 = vrot.lane.b32.xlu0 %v2379_v3, %s2249_s30  ;;  %v246_v6 = vrot.slane %v2379_v3, 7  ;;  %v265_v7 = vrot.slane %v2379_v3, 1  ;;  %v240_v8 = vld [vmem:[%s2375_s7 + $0x10] sm:$0xff]  ;;  %v247_v9 = vrot.slane %v239_v4, 7  ;;  %v242_v13 = vld [vmem:[%s2375_s7 + $0x20] sm:$0xff] }
  0x3c   : > { %v266_v10 = vrot.slane %v239_v4, 1  ;;  %v248_v11 = vrot.slane %v240_v8, 7  ;;  %v267_v12 = vrot.slane %v240_v8, 1  ;;  %v245_v14 = vld [vmem:[%s2375_s7 + $0x38] sm:$0xff]  ;;  %v243_v17 = vld [vmem:[%s2375_s7 + $0x28] sm:$0xff]  ;;  %v268_v20 = vrot.slane %v241_v2, 1 }
  0x3d   : > { %v253_v18 = vrot.slane %v245_v14, 7  ;;  %v269_v22 = vrot.slane %v242_v13, 1  ;;  %v251_v23 = vrot.slane %v243_v17, 7  ;;  %v263_v27 = vsel %vm256_vm2, %v246_v6, %v247_v9  ;;  %v244_v31 = vld [vmem:[%s2375_s7 + $0x30] sm:$0xff]  ;;  %s1742_s10 = sshll.u32 %s232_s8, 4  ;;  %s2818_s11 = scalar_lea.sflag [#allocation4], %s230_s26  ;;  %s2813_s10 = int_to_ptr.vmem [resolvable:$true] %s1742_s10 }
  0x3e   : > { %v280_v16 = vsel %vm273_vm1, %v265_v7, %v266_v10  ;;  %v279_v21 = vsel %vm273_vm1, %v266_v10, %v267_v12  ;;  %v261_v25 = vsel %vm256_vm2, %v248_v11, %v249_v5  ;;  %v262_v29 = vsel %vm256_vm2, %v247_v9, %v248_v11  ;;  %s2178_s12 = scalar_lea.vmem %s2813_s10, 256  ;;  %p2878_p9 = scmp.ne.s32.totalorder %s2869_s28, 0 }
  0x3f   : > { %292 = vrot.lane.b32.xlu0 %v239_v4, %s2249_s30  ;;  %322 = vrot.lane.b32.xlu1 %v280_v16, %s2250_s15  ;;  %v264_v26 = vsel %vm256_vm2, %v253_v18, %v246_v6  ;;  %v250_v30 = vrot.slane %v242_v13, 7  ;;  %v252_v34 = vrot.slane %v244_v31, 7  ;;  %v278_v35 = vsel %vm273_vm1, %v267_v12, %v268_v20  ;;  %v1123_v16 = vld [vmem:[#allocation2 + $0x48] sm:$0xff]  ;;  %p2179_p6 = scmp.ne.s32.totalorder %s2813_s10, %s2178_s12  ;;  %s2253_s13 = smov [#allocation5]  }
  0x40   : > { %v277_v36 = vsel %vm273_vm1, %v268_v20, %v269_v22  ;;  %v270_v39 = vrot.slane %v243_v17, 1  ;;  %v271_v40 = vrot.slane %v244_v31, 1  ;;  %v272_v43 = vrot.slane %v245_v14, 1  ;;  %s2182_s14 = sshll.u32 %s2253_s13, 4  ;;  %s2183_s14 = int_to_ptr.vmem [resolvable:$false] %s2182_s14 }
  0x41   : > { %v260_v32 = vsel %vm256_vm2, %v249_v5, %v250_v30  ;;  %v259_v33 = vsel %vm256_vm2, %v250_v30, %v251_v23  ;;  %v258_v37 = vsel %vm256_vm2, %v251_v23, %v252_v34  ;;  %v257_v38 = vsel %vm256_vm2, %v252_v34, %v253_v18  ;;  %v1124_v18 = vld [vmem:[#allocation2 + $0x50] sm:$0xff]  ;;  %v1118_v34 = vld [vmem:[#allocation2 + $0x28] sm:$0xff]  ;;  %p2180_p10 = pnand %p2179_p6, %p2878_p9  ;;  %s2184_s16 = scalar_lea.vmem %s2183_s14, 512 }
  0x42   : > { %v276_v41 = vsel %vm273_vm1, %v269_v22, %v270_v39  ;;  %v275_v42 = vsel %vm273_vm1, %v270_v39, %v271_v40  ;;  %v274_v44 = vsel %vm273_vm1, %v271_v40, %v272_v43  ;;  %v281_v45 = vsel %vm273_vm1, %v272_v43, %v265_v7  ;;  %v1127_v22 = vld [vmem:[#allocation2 + $0x68] sm:$0xff]  ;;  %v1115_v30 = vld [vmem:[#allocation2 + $0x10] sm:$0xff]  ;;  %v1322_v39 = vld [vmem:[#allocation2 + $0x80] sm:$0xff]  ;;  %p2185_p2 = scmp.lt.s32.totalorder %s2813_s10, %s2183_s14  ;;  %p2186_p3 = scmp.lt.s32.totalorder %s2184_s16, %s2178_s12 }
  0x43   : > { %294 = vrot.lane.b32.xlu0 %v240_v8, %s2249_s30  ;;  %324 = vrot.lane.b32.xlu1 %v279_v21, %s2250_s15  ;;  %v2041_v20 = vpack.c.bf16 %v1125_v19, %v1124_v18  ;;  %v1126_v21 = vld [vmem:[#allocation2 + $0x60] sm:$0xff]  ;;  %v1323_v40 = vld [vmem:[#allocation2 + $0x88] sm:$0xff]  ;;  %v2252_v43 = vmov 1983009808   ;;  %p2181_p12 = pneg %p2180_p10 }
  0x44   : > { %v2045_v23 = vpack.c.bf16 %v1127_v22, %v1126_v21  ;;  %p2187_p4 = por %p2186_p3, %p2185_p2 }
  0x46   : > { %p2188_p7 = pnand %p2187_p4, %p2181_p12 }
  0x47   : > { %326 = vrot.lane.b32.xlu0 %v278_v35, %s2250_s15  ;;  %328 = vrot.lane.b32.xlu1 %v277_v36, %s2250_s15  ;;  %v1119_v36 = vld [vmem:[#allocation2 + $0x30] sm:$0xff] }
  0x4b   : > { %298 = vrot.lane.b32.xlu0 %v242_v13, %s2249_s30  ;;  %300 = vrot.lane.b32.xlu1 %v243_v17, %s2249_s30  ;;  %v2037_v17 = vpack.c.bf16 %v1123_v16, %v1122_v15 }
  0x4d   : > { %2038 = vmatprep.subr.bf16.mxu0 %v2037_v17 }
  0x4f   : > { %330 = vrot.lane.b32.xlu0 %v276_v41, %s2250_s15  ;;  %332 = vrot.lane.b32.xlu1 %v275_v42, %s2250_s15  ;;  %v2479_v41 = vpack.c.bf16 %v1323_v40, %v1322_v39  ;;  %v2485_v42 = vld [vmem:[%s2862_s2] ss:$0 sm:$0xff] }
  0x53   : > { %302 = vrot.lane.b32.xlu0 %v244_v31, %s2249_s30  ;;  %304 = vrot.lane.b32.xlu1 %v245_v14, %s2249_s30  ;;  %v1116_v31 = vld [vmem:[#allocation2 + $0x18] sm:$0xff]  ;;  %s2810_s30 = scalar_lea.hbm %s2865_s5, %s1902_s9 }
  0x57   : > { %334 = vrot.lane.b32.xlu0 %v274_v44, %s2250_s15  ;;  %336 = vrot.lane.b32.xlu1 %v281_v45, %s2250_s15  ;;  %v604_v44 = vunpack.c.l.s4 %v2252_v43 }
  0xad   : > { %v297_v46 = vpop.permute.xlu1 %296  ;;  %v291_v47 = vpop.permute.xlu0 %290 }
  0xae   : > { %v347_v48 = vsel %vm346_vm5, %v264_v26, %v291_v47  ;;  %v350_v56 = vsel %vm346_vm5, %v261_v25, %v297_v46  ;;  %v1129_v25 = vld [vmem:[#allocation2 + $0x78] sm:$0xff]  ;;  %v1113_v26 = vld [vmem:[#allocation2] sm:$0xff] }
  0xb1   : > { %v293_v49 = vpop.permute.xlu0 %292  ;;  %v323_v50 = vpop.permute.xlu1 %322 }
  0xb2   : > { %v356_v51 = vsel %vm355_vm6, %v347_v48, %v323_v50  ;;  %v348_v52 = vsel %vm346_vm5, %v263_v27, %v293_v49  ;;  %v2049_v27 = vpack.c.bf16 %v1129_v25, %v1128_v24  ;;  %v605_v50 = vunpack.c.0.s8 %v604_v44 }
  0xb3   : > { %1953 = vmatprep.mubr.msk.f32.mxu0 %vm373_vm7, %v356_v51 }
  0xb5   : > { %v295_v53 = vpop.permute.xlu0 %294  ;;  %v325_v54 = vpop.permute.xlu1 %324 }
  0xb6   : > { %v357_v55 = vsel %vm355_vm6, %v348_v52, %v325_v54  ;;  %v349_v57 = vsel %vm346_vm5, %v262_v29, %v295_v53  ;;  %v2053_v29 = vpack.c.bf16 %v1114_v28, %v1113_v26 }
  0xb7   : > { %1954 = vmatmul.mubr.msk.f32.vlgmr.msra.gmra.mrb[0].mxu0 %vm373_vm7, %v357_v55 }
  0xb8   : > { %2040 = vmatpush3.bf16.msra.mxu0 %v2037_v17  ;;  %2054 = vmatprep.subr.bf16.mxu1 %v2053_v29 }
  0xb9   : > { %v327_v58 = vpop.permute.xlu0 %326  ;;  %v329_v59 = vpop.permute.xlu1 %328  ;;  %2042 = vmatprep.subr.bf16.mxu0 %v2041_v20  ;;  %2056 = vmatpush3.bf16.msra.mxu1 %v2053_v29 }
  0xba   : > { %v358_v60 = vsel %vm355_vm6, %v349_v57, %v327_v58  ;;  %v359_v61 = vsel %vm355_vm6, %v350_v56, %v329_v59  ;;  %v2500_v59 = vsub.s32 %v605_v50, %v2370_v1 }
  0xbb   : > { %1956 = vmatprep.mubr.msk.f32.mxu0 %vm373_vm7, %v358_v60 }
  0xbc   : > { %1957 = vmatmul.mubr.msk.f32.gmra.mrb[2].mxu0 %vm373_vm7, %v359_v61 }
  0xbd   : > { %v299_v62 = vpop.permute.xlu0 %298  ;;  %v301_v63 = vpop.permute.xlu1 %300  ;;  %2044 = vmatpush3.bf16.msra.mxu0 %v2041_v20 }
  0xbe   : > { %v351_v0 = vsel %vm346_vm5, %v260_v32, %v299_v62  ;;  %v352_v2 = vsel %vm346_vm5, %v259_v33, %v301_v63  ;;  %2046 = vmatprep.subr.bf16.mxu0 %v2045_v23  ;;  %v1117_v32 = vld [vmem:[#allocation2 + $0x20] sm:$0xff]  ;;  %v2057_v33 = vpack.c.bf16 %v1116_v31, %v1115_v30 }
  0xbf   : > { %v2061_v35 = vpack.c.bf16 %v1118_v34, %v1117_v32 }
  0xc0   : > { %2058 = vmatprep.subr.bf16.mxu1 %v2057_v33 }
  0xc1   : > { %v331_v3 = vpop.permute.xlu0 %330  ;;  %v333_v4 = vpop.permute.xlu1 %332  ;;  %2048 = vmatpush3.bf16.msra.mxu0 %v2045_v23  ;;  %2060 = vmatpush3.bf16.msra.mxu1 %v2057_v33 }
  0xc2   : > { %v360_v5 = vsel %vm355_vm6, %v351_v0, %v331_v3  ;;  %v361_v6 = vsel %vm355_vm6, %v352_v2, %v333_v4  ;;  %2050 = vmatprep.subr.bf16.mxu0 %v2049_v27  ;;  %2062 = vmatprep.subr.bf16.mxu1 %v2061_v35 }
  0xc3   : > { %1959 = vmatprep.mubr.msk.f32.mxu0 %vm373_vm7, %v360_v5  ;;  %v2514_v5 = vsub.s32 0, %v2370_v1 }
  0xc4   : > { %1960 = vmatmul.mubr.msk.f32.gmra.mrb[4].mxu0 %vm373_vm7, %v361_v6 }
  0xc5   : > { %v303_v7 = vpop.permute.xlu0 %302  ;;  %v305_v8 = vpop.permute.xlu1 %304  ;;  %2052 = vmatpush3.bf16.msra.mxu0 %v2049_v27  ;;  %2064 = vmatpush3.bf16.msra.mxu1 %v2061_v35 }
  0xc6   : > { %v353_v9 = vsel %vm346_vm5, %v258_v37, %v303_v7  ;;  %v354_v10 = vsel %vm346_vm5, %v257_v38, %v305_v8  ;;  %v1120_v37 = vld [vmem:[#allocation2 + $0x38] sm:$0xff] }
  0xc7   : > { %v2065_v38 = vpack.c.bf16 %v1120_v37, %v1119_v36 }
  0xc9   : > { %v335_v11 = vpop.permute.xlu0 %334  ;;  %v337_v12 = vpop.permute.xlu1 %336  ;;  %2066 = vmatprep.subr.bf16.mxu1 %v2065_v38 }
  0xca   : > { %v362_v13 = vsel %vm355_vm6, %v353_v9, %v335_v11  ;;  %v363_v14 = vsel %vm355_vm6, %v354_v10, %v337_v12  ;;  %2068 = vmatpush3.bf16.msra.mxu1 %v2065_v38  ;;  %v2522_v9 = vadd.s32 56, %v2370_v1 }
  0xcb   : > { %1962 = vmatprep.mubr.msk.f32.mxu0 %vm373_vm7, %v362_v13  ;;  %2070 = vmatprep.subr.bf16.mxu1 %v2479_v41 }
  0xcc   : > { %1963 = vmatmul.mubr.msk.f32.gmra.mrb[6].mxu0 %vm373_vm7, %v363_v14  ;;  %vm537_vm9 = vcmp.le.s32.totalorder %v2522_v9, 62 }
 0x18a   : > { %v1955_v45 = vpop.f32.mrb[0].mxu0 }
 0x18b   : > { %v474_v46 = vadd.f32 %v1955_v45, %v2485_v42  ;;  %v468_v47 = vpop.f32.mrb[1].mxu0 }
 0x18c   : > { %v469_v48 = vadd.f32 %v2485_v42, %v468_v47 }
 0x18d   : > { %v508_v49 = vmax.f32 %v474_v46, 0.0 }
 0x18e   : > { %v507_v51 = vmax.f32 %v469_v48, 0.0 }
 0x18f   : > { %v1958_v52 = vpop.f32.mrb[2].mxu0  ;;  %v571_v56 = vrot.slane %v508_v49, 1 }
 0x190   : > { %v2492_v53 = vsel %vm522_vm8, %v507_v51, 0.0  ;;  %v2495_v54 = vadd.f32 %v1958_v52, %v2485_v42  ;;  %v478_v55 = vpop.f32.mrb[3].mxu0 }
 0x191   : > { %v570_v57 = vrot.slane %v2492_v53, 1  ;;  %v479_v58 = vadd.f32 %v2485_v42, %v478_v55 }
 0x192   : > { %v510_v60 = vmax.f32 %v2495_v54, 0.0 }
 0x193   : > { %v584_v61 = vsel %vm273_vm1, %v570_v57, %v571_v56  ;;  %v509_v62 = vmax.f32 %v479_v58, 0.0 }
 0x194   : > { %v586_v63 = vmax.f32 %v2492_v53, %v584_v61  ;;  %v2510_v0 = vrot.slane %v510_v60, 1 }
 0x195   : > { %v572_v2 = vrot.slane %v509_v62, 1 }
 0x196   : > { %v602_v3 = vcombine.high %v586_v63, %v586_v63  ;;  %v609_v4 = vrot.slane %v586_v63, %v2500_v59 }
 0x197   : > { %v582_v6 = vsel %vm273_vm1, %v572_v2, %v2510_v0  ;;  %v583_v7 = vsel %vm273_vm1, %v571_v56, %v572_v2  ;;  %v1961_v8 = vpop.f32.mrb[4].mxu0 }
 0x198   : > { %v616_v10 = vrot.slane %v602_v3, %v2500_v59  ;;  %v617_v11 = vcombine.high %v609_v4, %v609_v4  ;;  %v1835_v12 = vrot.slane %v609_v4, 9  ;;  %v587_v13 = vmax.f32 %v508_v49, %v583_v7  ;;  %v488_v14 = vpop.f32.mrb[5].mxu0 }
 0x199   : > { %v588_v15 = vmax.f32 %v509_v62, %v582_v6  ;;  %v2526_v16 = vadd.f32 %v1961_v8, %v2485_v42  ;;  %v489_v17 = vadd.f32 %v2485_v42, %v488_v14 }
 0x19a   : > { %v618_v18 = vcombine.high %v616_v10, %v616_v10  ;;  %v1836_v19 = vrot.slane %v617_v11, 9  ;;  %v1837_v20 = vrot.slane %v616_v10, 9  ;;  %v2529_v21 = vmax.f32 %v609_v4, %v1835_v12 }
 0x19b   : > { %v619_v22 = vcombine.high %v587_v13, %v587_v13  ;;  %v626_v23 = vrot.slane %v587_v13, %v2500_v59  ;;  %v636_v24 = vcombine.high %v588_v15, %v588_v15  ;;  %v643_v25 = vrot.slane %v588_v15, %v2500_v59 }
 0x19c   : > { %v1838_v26 = vrot.slane %v618_v18, 9  ;;  %v2534_v27 = vmax.f32 %v617_v11, %v1836_v19  ;;  %v2536_v28 = vmax.f32 %v616_v10, %v1837_v20  ;;  %v933_v29 = vrot.slane %v2529_v21, %v2514_v5 }
 0x19d   : > { %v2541_v30 = vrot.slane %v619_v22, %v2500_v59  ;;  %v2543_v31 = vcombine.high %v626_v23, %v626_v23  ;;  %v650_v32 = vrot.slane %v636_v24, %v2500_v59  ;;  %v651_v33 = vcombine.high %v643_v25, %v643_v25 }
 0x19e   : > { %v2546_v34 = vmax.f32 %v618_v18, %v1838_v26  ;;  %v937_v35 = vrot.slane %v2534_v27, %v2514_v5  ;;  %v941_v36 = vrot.slane %v2536_v28, %v2514_v5  ;;  %v1839_v37 = vrot.slane %v626_v23, 9 }
 0x19f   : > { %v652_v38 = vcombine.high %v650_v32, %v650_v32  ;;  %v1843_v39 = vrot.slane %v643_v25, 9  ;;  %v1844_v40 = vrot.slane %v651_v33, 9  ;;  %v1845_v43 = vrot.slane %v650_v32, 9  ;;  %v1964_v44 = vpop.f32.mrb[6].mxu0 }
 0x1a0   : > { %v945_v45 = vrot.slane %v2546_v34, %v2514_v5  ;;  %v2554_v46 = vmax.f32 %v626_v23, %v1839_v37  ;;  %v512_v47 = vmax.f32 %v2526_v16, 0.0  ;;  %v511_v48 = vmax.f32 %v489_v17, 0.0  ;;  %v498_v49 = vpop.f32.mrb[7].mxu0 }
 0x1a1   : > { %v1846_v50 = vrot.slane %v652_v38, 9  ;;  %v874_v51 = vmax.f32 %v643_v25, %v1843_v39  ;;  %v875_v52 = vmax.f32 %v651_v33, %v1844_v40  ;;  %v876_v55 = vmax.f32 %v650_v32, %v1845_v43 }
 0x1a2   : > { %v575_v56 = vrot.slane %v512_v47, 1  ;;  %v574_v58 = vrot.slane %v511_v48, 1  ;;  %v504_v61 = vadd.f32 %v1964_v44, %v2485_v42  ;;  %v499_v62 = vadd.f32 %v2485_v42, %v498_v49 }
 0x1a3   : > { %v2559_v63 = vmax.f32 %v652_v38, %v1846_v50  ;;  %v965_v2 = vrot.slane %v874_v51, %v2514_v5  ;;  %v969_v3 = vrot.slane %v875_v52, %v2514_v5  ;;  %v973_v4 = vrot.slane %v876_v55, %v2514_v5 }
 0x1a4   : > { %v580_v6 = vsel %vm273_vm1, %v574_v58, %v575_v56  ;;  %v581_v7 = vsel %vm273_vm1, %v2510_v0, %v574_v58  ;;  %v514_v8 = vmax.f32 %v504_v61, 0.0  ;;  %v513_v10 = vmax.f32 %v499_v62, 0.0 }
 0x1a5   : > { %v977_v42 = vrot.slane %v2559_v63, %v2514_v5  ;;  %v1072_v11 = vsel %vm1058_vm10, %v969_v3, %v965_v2  ;;  %v589_v12 = vmax.f32 %v510_v60, %v581_v7  ;;  %v590_v13 = vmax.f32 %v511_v48, %v580_v6 }
 0x1a6   : > { %v2575_v14 = vsel %vm1060_vm11, %v973_v4, %v1072_v11  ;;  %v569_v15 = vsel %vm537_vm9, %v514_v8, 0.0  ;;  %v576_v16 = vrot.slane %v513_v10, 1  ;;  %v2581_v0 = vcombine.high %v2541_v30, %v2541_v30 }
 0x1a7   : > { %v653_v17 = vcombine.high %v589_v12, %v589_v12  ;;  %v660_v18 = vrot.slane %v589_v12, %v2500_v59  ;;  %v670_v19 = vcombine.high %v590_v13, %v590_v13  ;;  %v677_v20 = vrot.slane %v590_v13, %v2500_v59 }
 0x1a8   : > { %v577_v54 = vrot.slane %v569_v15, 1  ;;  %v579_v60 = vsel %vm273_vm1, %v575_v56, %v576_v16  ;;  %v1840_v22 = vrot.slane %v2543_v31, 9  ;;  %v1841_v9 = vrot.slane %v2541_v30, 9 }
 0x1a9   : > { %v2590_v23 = vrot.slane %v653_v17, %v2500_v59  ;;  %v668_v24 = vcombine.high %v660_v18, %v660_v18  ;;  %v684_v25 = vrot.slane %v670_v19, %v2500_v59  ;;  %v685_v26 = vcombine.high %v677_v20, %v677_v20 }
 0x1aa   : > { %v1847_v32 = vrot.slane %v660_v18, 9  ;;  %v1851_v33 = vrot.slane %v677_v20, 9  ;;  %v585_v37 = vsel %vm273_vm1, %v577_v54, %v570_v57  ;;  %v578_v38 = vsel %vm273_vm1, %v576_v16, %v577_v54 }
 0x1ab   : > { %v686_v39 = vcombine.high %v684_v25, %v684_v25  ;;  %v1848_v40 = vrot.slane %v668_v24, 9  ;;  %v1849_v43 = vrot.slane %v2590_v23, 9  ;;  %v1852_v44 = vrot.slane %v685_v26, 9 }
 0x1ac   : > { %v1853_v48 = vrot.slane %v684_v25, 9  ;;  %v2600_v49 = vmax.f32 %v660_v18, %v1847_v32  ;;  %v882_v50 = vmax.f32 %v677_v20, %v1851_v33  ;;  %v593_v51 = vmax.f32 %v569_v15, %v585_v37 }
 0x1ad   : > { %v1854_v52 = vrot.slane %v686_v39, 9  ;;  %v2602_v55 = vmax.f32 %v668_v24, %v1848_v40  ;;  %v2605_v53 = vmax.f32 %v2590_v23, %v1849_v43  ;;  %v883_v57 = vmax.f32 %v685_v26, %v1852_v44 }
 0x1ae   : > { %v2607_v56 = vmax.f32 %v684_v25, %v1853_v48  ;;  %v981_v58 = vrot.slane %v2600_v49, %v2514_v5  ;;  %v997_v61 = vrot.slane %v882_v50, %v2514_v5  ;;  %v721_v62 = vcombine.high %v593_v51, %v593_v51 }
 0x1af   : > { %v2612_v2 = vmax.f32 %v686_v39, %v1854_v52  ;;  %v1001_v3 = vrot.slane %v883_v57, %v2514_v5  ;;  %v728_v4 = vrot.slane %v593_v51, %v2500_v59  ;;  %v591_v6 = vmax.f32 %v512_v47, %v579_v60 }
 0x1b0   : > { %v1005_v7 = vrot.slane %v2607_v56, %v2514_v5  ;;  %v2619_v8 = vrot.slane %v721_v62, %v2500_v59  ;;  %v592_v11 = vmax.f32 %v513_v10, %v578_v38  ;;  %v1842_v12 = vrot.slane %v2581_v0, 9 }
 0x1b1   : > { %v1009_v13 = vrot.slane %v2612_v2, %v2514_v5  ;;  %v2625_v15 = vsel %vm1058_vm10, %v1001_v3, %v997_v61  ;;  %v736_v16 = vcombine.high %v728_v4, %v728_v4  ;;  %v1863_v17 = vrot.slane %v728_v4, 9 }
 0x1b2   : > { %v1865_v47 = vrot.slane %v2619_v8, 9  ;;  %v687_v18 = vcombine.high %v591_v6, %v591_v6  ;;  %v694_v19 = vrot.slane %v591_v6, %v2500_v59  ;;  %v704_v20 = vcombine.high %v592_v11, %v592_v11 }
 0x1b3   : > { %v1864_v10 = vrot.slane %v736_v16, 9  ;;  %v2629_v54 = vmax.f32 %v728_v4, %v1863_v17  ;;  %v711_v60 = vrot.slane %v592_v11, %v2500_v59  ;;  %v871_v24 = vmax.f32 %v2543_v31, %v1840_v22 }
 0x1b4   : > { %v701_v25 = vrot.slane %v687_v18, %v2500_v59  ;;  %v702_v26 = vcombine.high %v694_v19, %v694_v19  ;;  %v718_v32 = vrot.slane %v704_v20, %v2500_v59  ;;  %v1855_v33 = vrot.slane %v694_v19, 9 }
 0x1b5   : > { %v2635_v37 = vmax.f32 %v736_v16, %v1864_v10  ;;  %v1045_v38 = vrot.slane %v2629_v54, %v2514_v5  ;;  %v719_v39 = vcombine.high %v711_v60, %v711_v60  ;;  %v1859_v40 = vrot.slane %v711_v60, 9 }
 0x1b6   : > { %v720_v43 = vcombine.high %v718_v32, %v718_v32  ;;  %v1861_v44 = vrot.slane %v718_v32, 9  ;;  %v886_v48 = vmax.f32 %v694_v19, %v1855_v33  ;;  %v872_v31 = vmax.f32 %v2541_v30, %v1841_v9 }
 0x1b7   : > { %v1860_v22 = vrot.slane %v719_v39, 9  ;;  %v890_v50 = vmax.f32 %v711_v60, %v1859_v40  ;;  %v873_v51 = vmax.f32 %v2581_v0, %v1842_v12  ;;  %v949_v52 = vrot.slane %v2554_v46, %v2514_v5 }
 0x1b8   : > { %v1862_v57 = vrot.slane %v720_v43, 9  ;;  %v892_v61 = vmax.f32 %v718_v32, %v1861_v44  ;;  %v953_v62 = vrot.slane %v871_v24, %v2514_v5  ;;  %v957_v3 = vrot.slane %v872_v31, %v2514_v5 }
 0x1b9   : > { %v891_v4 = vmax.f32 %v719_v39, %v1860_v22  ;;  %v1029_v6 = vrot.slane %v890_v50, %v2514_v5  ;;  %v961_v11 = vrot.slane %v873_v51, %v2514_v5  ;;  %v1059_v30 = vsel %vm1058_vm10, %v937_v35, %v933_v29 }
 0x1ba   : > { %v893_v46 = vmax.f32 %v720_v43, %v1862_v57  ;;  %v1037_v0 = vrot.slane %v892_v61, %v2514_v5  ;;  %v1061_v9 = vsel %vm1060_vm11, %v941_v36, %v1059_v30  ;;  %v669_v12 = vcombine.high %v2590_v23, %v2590_v23 }
 0x1bb   : > { %v1033_v16 = vrot.slane %v891_v4, %v2514_v5  ;;  %v1063_v21 = vsel %vm1062_vm12, %v945_v45, %v1061_v9  ;;  %v985_v27 = vrot.slane %v2602_v55, %v2514_v5  ;;  %v989_v29 = vrot.slane %v2605_v53, %v2514_v5 }
 0x1bc   : > { %v1041_v28 = vrot.slane %v893_v46, %v2514_v5  ;;  %v1065_v35 = vsel %vm1064_vm13, %v949_v52, %v1063_v21  ;;  %v1850_v36 = vrot.slane %v669_v12, 9  ;;  %v1074_v23 = vsel %vm1062_vm12, %v977_v42, %v2575_v14  ;;  %v1324_v46 = vld [vmem:[#allocation2 + $0x90] sm:$0xff] }
 0x1bd   : > { %v1086_v34 = vsel %vm1058_vm10, %v1033_v16, %v1029_v6  ;;  %v1067_v45 = vsel %vm1066_vm14, %v953_v62, %v1065_v35  ;;  %v1075_v55 = vsel %vm1064_vm13, %v981_v58, %v1074_v23  ;;  %v703_v53 = vcombine.high %v701_v25, %v701_v25  ;;  %v1326_v23 = vld [vmem:[#allocation2 + $0xa0] sm:$0xff] }
 0x1be   : > { %v1069_v17 = vsel %vm1068_vm15, %v957_v3, %v1067_v45  ;;  %v881_v18 = vmax.f32 %v669_v12, %v1850_v36  ;;  %v1076_v19 = vsel %vm1066_vm14, %v985_v27, %v1075_v55  ;;  %v1856_v20 = vrot.slane %v702_v26, 9  ;;  %v1328_v55 = vld [vmem:[#allocation2 + $0xb0] sm:$0xff] }
 0x1bf   : > { %v1071_v63 = vsel %vm1070_vm0, %v961_v11, %v1069_v17  ;;  %v1077_v42 = vsel %vm1068_vm15, %v989_v29, %v1076_v19  ;;  %v1857_v14 = vrot.slane %v701_v25, 9  ;;  %v1858_v10 = vrot.slane %v703_v53, 9 }
 0x1c0   : > { %v1105_v60 = vrot.slane %v1071_v63, 1  ;;  %1981 = vmatprep.mubr.msk.f32.mxu0 %vm1130_vm3, %v1071_v63  ;;  %v993_v49 = vrot.slane %v881_v18, %v2514_v5  ;;  %v887_v24 = vmax.f32 %v702_v26, %v1856_v20  ;;  %v1013_v58 = vrot.slane %v886_v48, %v2514_v5 }
 0x1c1   : > { %v888_v32 = vmax.f32 %v701_v25, %v1857_v14  ;;  %v889_v33 = vmax.f32 %v703_v53, %v1858_v10  ;;  %v1080_v39 = vsel %vm1060_vm11, %v1005_v7, %v2625_v15  ;;  %v737_v40 = vcombine.high %v2619_v8, %v2619_v8  ;;  %v1329_v53 = vld [vmem:[#allocation2 + $0xb8] sm:$0xff] }
 0x1c2   : > { %v1078_v43 = vsel %vm1070_vm0, %v993_v49, %v1077_v42  ;;  %v1017_v44 = vrot.slane %v887_v24, %v2514_v5  ;;  %v1081_v26 = vsel %vm1062_vm12, %v1009_v13, %v1080_v39  ;;  %v896_v25 = vmax.f32 %v2619_v8, %v1865_v47  ;;  %v1879_v42 = vld [vmem:[%s2864_s4] ss:$0 sm:$0xff] }
 0x1c3   : > { %1982 = vmatmul.mubr.msk.f32.vlgmr.msra.gmra.mrb[8].mxu0 %vm1130_vm3, %v1078_v43  ;;  %v1021_v56 = vrot.slane %v888_v32, %v2514_v5  ;;  %v1025_v7 = vrot.slane %v889_v33, %v2514_v5  ;;  %v1082_v15 = vsel %vm1064_vm13, %v1013_v58, %v1081_v26  ;;  %v1866_v48 = vrot.slane %v737_v40, 9 }
 0x1c4   : > { %v1083_v31 = vsel %vm1066_vm14, %v1017_v44, %v1082_v15  ;;  %v1049_v2 = vrot.slane %v2635_v37, %v2514_v5  ;;  %v1053_v13 = vrot.slane %v896_v25, %v2514_v5  ;;  %v1087_v22 = vsel %vm1060_vm11, %v1037_v0, %v1086_v34  ;;  %v1325_v0 = vld [vmem:[#allocation2 + $0x98] sm:$0xff]  ;;  %v1327_v34 = vld [vmem:[#allocation2 + $0xa8] sm:$0xff] }
 0x1c5   : > { %v1084_v8 = vsel %vm1068_vm15, %v1021_v56, %v1083_v31  ;;  %v897_v47 = vmax.f32 %v737_v40, %v1866_v48  ;;  %v1088_v50 = vsel %vm1062_vm12, %v1041_v28, %v1087_v22  ;;  %v1097_v51 = vrot.slane %v1071_v63, 7 }
 0x1c6   : > { %v1085_v52 = vsel %vm1070_vm0, %v1025_v7, %v1084_v8  ;;  %v1089_v57 = vsel %vm1064_vm13, %v1045_v38, %v1088_v50  ;;  %v1098_v61 = vrot.slane %v1078_v43, 7  ;;  %v1106_v62 = vrot.slane %v1078_v43, 1 }
 0x1c7   : > { %v1099_v37 = vrot.slane %v1085_v52, 7  ;;  %v1107_v3 = vrot.slane %v1085_v52, 1  ;;  %1984 = vmatprep.mubr.msk.f32.mxu0 %vm1130_vm3, %v1085_v52  ;;  %v1057_v4 = vrot.slane %v897_v47, %v2514_v5  ;;  %v1090_v6 = vsel %vm1066_vm14, %v1049_v2, %v1089_v57 }
 0x1c8   : > { %v1091_v11 = vsel %vm1068_vm15, %v1053_v13, %v1090_v6  ;;  %v1103_v30 = vsel %vm256_vm2, %v1097_v51, %v1098_v61  ;;  %v1111_v54 = vsel %vm273_vm1, %v1105_v60, %v1106_v62  ;;  %v2073_v27 = vpack.c.bf16 %v1325_v0, %v1324_v46 }
 0x1c9   : > { %v1092_v38 = vsel %vm1070_vm0, %v1057_v4, %v1091_v11  ;;  %v1102_v9 = vsel %vm256_vm2, %v1098_v61, %v1099_v37  ;;  %v1110_v12 = vsel %vm273_vm1, %v1106_v62, %v1107_v3  ;;  %v2077_v45 = vpack.c.bf16 %v1327_v34, %v1326_v23 }
 0x1ca   : > { %v1108_v16 = vrot.slane %v1092_v38, 1  ;;  %1985 = vmatmul.mubr.msk.f32.gmra.mrb[10].mxu0 %vm1130_vm3, %v1092_v38  ;;  %v1100_v21 = vrot.slane %v1092_v38, 7  ;;  %v2081_v17 = vpack.c.bf16 %v1329_v53, %v1328_v55  ;;  %v517_v58 = vadd.s32 24, %v2370_v1 }
 0x1cc   : > { %v1104_v29 = vsel %vm256_vm2, %v1100_v21, %v1097_v51  ;;  %v1101_v28 = vsel %vm256_vm2, %v1099_v37, %v1100_v21  ;;  %v1109_v35 = vsel %vm273_vm1, %v1107_v3, %v1108_v16  ;;  %v1112_v36 = vsel %vm273_vm1, %v1108_v16, %v1105_v60 }
 0x1cd   : > { %2003 = vmatprep.mubr.msk.f32.mxu1 %vm1130_vm3, %v1104_v29  ;;  %vm1449_vm2 = vcmp.le.s32.totalorder %v517_v58, 29 }
 0x1ce   : > { %2004 = vmatmul.mubr.msk.f32.vlgmr.msra.gmra.mrb[0].mxu1 %vm1130_vm3, %v1103_v30 }
 0x1cf   : > { %2072 = vmatpush3.bf16.msra.mxu1 %v2479_v41  ;;  %2006 = vmatprep.mubr.msk.f32.mxu1 %vm1130_vm3, %v1102_v9 }
 0x1d0   : > { %2074 = vmatprep.subr.bf16.mxu1 %v2073_v27 }
 0x1d2   : > { %2007 = vmatmul.mubr.msk.f32.gmra.mrb[2].mxu1 %vm1130_vm3, %v1101_v28 }
 0x1d3   : > { %2076 = vmatpush3.bf16.msra.mxu1 %v2073_v27  ;;  %2025 = vmatprep.mubr.msk.f32.mxu1 %vm1130_vm3, %v1111_v54 }
 0x1d4   : > { %2078 = vmatprep.subr.bf16.mxu1 %v2077_v45 }
 0x1d7   : > { %2080 = vmatpush3.bf16.msra.mxu1 %v2077_v45 }
 0x1d8   : > { %2082 = vmatprep.subr.bf16.mxu1 %v2081_v17 }
 0x1db   : > { %2084 = vmatpush3.bf16.msra.mxu1 %v2081_v17 }
 0x1de   : > { %2026 = vmatmul.mubr.msk.f32.vlgmr.msra.gmra.mrb[0].mxu1 %vm1130_vm3, %v1110_v12 }
 0x1df   : > { %2028 = vmatprep.mubr.msk.f32.mxu1 %vm1130_vm3, %v1109_v35 }
 0x1e2   : > { %2029 = vmatmul.mubr.msk.f32.gmra.mrb[2].mxu1 %vm1130_vm3, %v1112_v36 }
 0x296   : > { %v1983_v41 = vpop.f32.mrb[8].mxu0 }
 0x297   : > { %v1205_v18 = vpop.f32.mrb[9].mxu0 }
 0x29d   : > { %v1986_v19 = vpop.f32.mrb[10].mxu0 }
 0x29e   : > { %v1215_v20 = vpop.f32.mrb[11].mxu0 }
 0x2b1   : > { %v2027_v63 = vpop.f32.mrb[0].mxu1 }
 0x2b2   : > { %v2085_v14 = vadd.f32 %v2027_v63, %v1983_v41  ;;  %v1408_v10 = vpop.f32.mrb[1].mxu1 }
 0x2b3   : > { %v2086_v60 = vadd.f32 %v1408_v10, %v1205_v18 }
 0x2b4   : > { %v1439_v49 = vadd.f32 %v2085_v14, %v1879_v42 }
 0x2b5   : > { %v1438_v24 = vadd.f32 %v2086_v60, %v1879_v42  ;;  %v2030_v32 = vpop.f32.mrb[2].mxu1 }
 0x2b6   : > { %v1443_v33 = vmax.f32 %v1439_v49, 0.0  ;;  %v2087_v39 = vadd.f32 %v2030_v32, %v1986_v19  ;;  %v1418_v40 = vpop.f32.mrb[3].mxu1 }
 0x2b7   : > { %v1442_v43 = vmax.f32 %v1438_v24, 0.0  ;;  %v2088_v44 = vadd.f32 %v1418_v40, %v1215_v20 }
 0x2b8   : > { %v1441_v26 = vadd.f32 %v2087_v39, %v1879_v42  ;;  %v1467_v7 = vrot.slane %v1443_v33, 1 }
 0x2b9   : > { %v1462_v25 = vsel %vm522_vm8, %v1442_v43, 0.0  ;;  %v1440_v56 = vadd.f32 %v2088_v44, %v1879_v42 }
 0x2ba   : > { %v1466_v15 = vrot.slane %v1462_v25, 1  ;;  %v1445_v48 = vmax.f32 %v1441_v26, 0.0 }
 0x2bb   : > { %v1444_v31 = vmax.f32 %v1440_v56, 0.0 }
 0x2bc   : > { %v1472_v2 = vsel %vm273_vm1, %v1466_v15, %v1467_v7  ;;  %v1465_v13 = vsel %vm1449_vm2, %v1445_v48, 0.0 }
 0x2bd   : > { %v1474_v22 = vmax.f32 %v1462_v25, %v1472_v2  ;;  %v1469_v8 = vrot.slane %v1465_v13, 1  ;;  %v1468_v47 = vrot.slane %v1444_v31, 1 }
 0x2bf   : > { %v1482_v50 = vcombine.high %v1474_v22, %v1474_v22  ;;  %v1489_v51 = vrot.slane %v1474_v22, %v2500_v59  ;;  %v1473_v52 = vsel %vm273_vm1, %v1469_v8, %v1466_v15  ;;  %v1470_v57 = vsel %vm273_vm1, %v1468_v47, %v1469_v8 }
 0x2c0   : > { %v1477_v61 = vmax.f32 %v1465_v13, %v1473_v52  ;;  %v1471_v62 = vsel %vm273_vm1, %v1467_v7, %v1468_v47  ;;  %v1476_v37 = vmax.f32 %v1444_v31, %v1470_v57 }
 0x2c1   : > { %v1496_v3 = vrot.slane %v1482_v50, %v2500_v59  ;;  %v1497_v4 = vcombine.high %v1489_v51, %v1489_v51  ;;  %v1880_v6 = vrot.slane %v1489_v51, 9  ;;  %v1475_v11 = vmax.f32 %v1443_v33, %v1471_v62 }
 0x2c2   : > { %v1533_v30 = vcombine.high %v1477_v61, %v1477_v61  ;;  %v1540_v46 = vrot.slane %v1477_v61, %v2500_v59  ;;  %v1516_v16 = vcombine.high %v1476_v37, %v1476_v37  ;;  %v1523_v21 = vrot.slane %v1476_v37, %v2500_v59 }
 0x2c3   : > { %v1498_v0 = vcombine.high %v1496_v3, %v1496_v3  ;;  %v1881_v54 = vrot.slane %v1497_v4, 9  ;;  %v1882_v38 = vrot.slane %v1496_v3, 9  ;;  %v1614_v9 = vmax.f32 %v1489_v51, %v1880_v6 }
 0x2c4   : > { %v1547_v12 = vrot.slane %v1533_v30, %v2500_v59  ;;  %v1499_v28 = vcombine.high %v1475_v11, %v1475_v11  ;;  %v1548_v36 = vcombine.high %v1540_v46, %v1540_v46  ;;  %v1892_v34 = vrot.slane %v1540_v46, 9 }
 0x2c5   : > { %v1883_v1 = vrot.slane %v1498_v0, 9  ;;  %v1615_v27 = vmax.f32 %v1497_v4, %v1881_v54  ;;  %v1616_v29 = vmax.f32 %v1496_v3, %v1882_v38  ;;  %v1649_v35 = vrot.slane %v1614_v9, %v2514_v5 }
 0x2c6   : > { %v1549_v23 = vcombine.high %v1547_v12, %v1547_v12  ;;  %v1506_v17 = vrot.slane %v1475_v11, %v2500_v59  ;;  %v1513_v19 = vrot.slane %v1499_v28, %v2500_v59  ;;  %v1893_v42 = vrot.slane %v1548_v36, 9 }
 0x2c7   : > { %v1617_v45 = vmax.f32 %v1498_v0, %v1883_v1  ;;  %v1653_v55 = vrot.slane %v1615_v27, %v2514_v5  ;;  %v1657_v53 = vrot.slane %v1616_v29, %v2514_v5  ;;  %v1894_v14 = vrot.slane %v1547_v12, 9 }
 0x2c8   : > { %v1514_v20 = vcombine.high %v1506_v17, %v1506_v17  ;;  %v1626_v10 = vmax.f32 %v1540_v46, %v1892_v34  ;;  %v1895_v60 = vrot.slane %v1549_v23, 9  ;;  %v1515_v49 = vcombine.high %v1513_v19, %v1513_v19 }
 0x2c9   : > { %v1661_v41 = vrot.slane %v1617_v45, %v2514_v5  ;;  %v1710_v18 = vsel %vm1058_vm10, %v1653_v55, %v1649_v35  ;;  %v1530_v24 = vrot.slane %v1516_v16, %v2500_v59  ;;  %v1531_v58 = vcombine.high %v1523_v21, %v1523_v21 }
 0x2ca   : > { %v1711_v63 = vsel %vm1060_vm11, %v1657_v53, %v1710_v18  ;;  %v1884_v33 = vrot.slane %v1506_v17, 9  ;;  %v1885_v39 = vrot.slane %v1514_v20, 9  ;;  %v1886_v40 = vrot.slane %v1513_v19, 9 }
 0x2cb   : > { %v1712_v32 = vsel %vm1062_vm12, %v1661_v41, %v1711_v63  ;;  %v1532_v43 = vcombine.high %v1530_v24, %v1530_v24  ;;  %v1887_v44 = vrot.slane %v1515_v49, 9  ;;  %v1888_v26 = vrot.slane %v1523_v21, 9 }
 0x2cc   : > { %v1889_v25 = vrot.slane %v1531_v58, 9  ;;  %v1890_v56 = vrot.slane %v1530_v24, 9  ;;  %v1618_v7 = vmax.f32 %v1506_v17, %v1884_v33  ;;  %v1619_v15 = vmax.f32 %v1514_v20, %v1885_v39 }
 0x2cd   : > { %v1620_v48 = vmax.f32 %v1513_v19, %v1886_v40  ;;  %v1891_v31 = vrot.slane %v1532_v43, 9  ;;  %v1621_v2 = vmax.f32 %v1515_v49, %v1887_v44  ;;  %v1622_v13 = vmax.f32 %v1523_v21, %v1888_v26 }
 0x2ce   : > { %v1623_v59 = vmax.f32 %v1531_v58, %v1889_v25  ;;  %v1627_v22 = vmax.f32 %v1548_v36, %v1893_v42  ;;  %v1624_v8 = vmax.f32 %v1530_v24, %v1890_v56  ;;  %v1665_v47 = vrot.slane %v1618_v7, %v2514_v5 }
 0x2cf   : > { %v1669_v50 = vrot.slane %v1619_v15, %v2514_v5  ;;  %v1625_v51 = vmax.f32 %v1532_v43, %v1891_v31  ;;  %v1681_v52 = vrot.slane %v1622_v13, %v2514_v5  ;;  %v1677_v61 = vrot.slane %v1621_v2, %v2514_v5 }
 0x2d0   : > { %v1685_v57 = vrot.slane %v1623_v59, %v2514_v5  ;;  %v1628_v62 = vmax.f32 %v1547_v12, %v1894_v14  ;;  %v1673_v37 = vrot.slane %v1620_v48, %v2514_v5  ;;  %v1689_v3 = vrot.slane %v1624_v8, %v2514_v5 }
 0x2d1   : > { %v1713_v4 = vsel %vm1064_vm13, %v1665_v47, %v1712_v32  ;;  %v1629_v6 = vmax.f32 %v1549_v23, %v1895_v60  ;;  %v1693_v11 = vrot.slane %v1625_v51, %v2514_v5  ;;  %v1697_v0 = vrot.slane %v1626_v10, %v2514_v5 }
 0x2d2   : > { %v1717_v30 = vsel %vm1058_vm10, %v1685_v57, %v1681_v52  ;;  %v1714_v46 = vsel %vm1066_vm14, %v1669_v50, %v1713_v4  ;;  %v1701_v9 = vrot.slane %v1627_v22, %v2514_v5  ;;  %v1705_v21 = vrot.slane %v1628_v62, %v2514_v5 }
 0x2d3   : > { %v1718_v54 = vsel %vm1060_vm11, %v1689_v3, %v1717_v30  ;;  %v1715_v38 = vsel %vm1068_vm15, %v1673_v37, %v1714_v46  ;;  %v1709_v27 = vrot.slane %v1629_v6, %v2514_v5 }
 0x2d4   : > { %v1719_v12 = vsel %vm1062_vm12, %v1693_v11, %v1718_v54  ;;  %v1716_v16 = vsel %vm1070_vm0, %v1677_v61, %v1715_v38 }
 0x2d5   : > { %v1720_v1 = vsel %vm1064_vm13, %v1697_v0, %v1719_v12  ;;  %1726 = vst [vmem:[%s232_s8] sm:$0xff] %v1716_v16 }
 0x2d6   : > { %v1721_v29 = vsel %vm1066_vm14, %v1701_v9, %v1720_v1 }
 0x2d7   : > { %v1722_v28 = vsel %vm1068_vm15, %v1705_v21, %v1721_v29 }
 0x2d8   : > { %v1723_v35 = vsel %vm1070_vm0, %v1709_v27, %v1722_v28 }
 0x2d9   : > { %1727 = vst [vmem:[%s232_s8 + $0x8] sm:$0xff] %v1723_v35 }
 0x2da   : > { %2191 = shalt.err (!%p2188_p7)
}
 0x2db   : > { %s2192_s17 = scalar_lea.hbm %s2810_s30, 256  ;;  %s2196_s26 = scalar_lea.hbm %s2865_s5, 512 }
 0x2dc   : > { %p2193_p8 = scmp.ne.s32.totalorder %s2810_s30, %s2192_s17  ;;  %p2197_p1 = scmp.lt.u32.totalorder %s2810_s30, %s2865_s5 }
 0x2dd   : > { %p2198_p0 = scmp.lt.u32.totalorder %s2196_s26, %s2192_s17  ;;  %p2200_p6 = scmp.lt.u32.totalorder %s2192_s17, %s2810_s30 }
 0x2de   : > { %p2194_p11 = pnand %p2193_p8, %p2878_p9 }
 0x2df   : > { %p2199_p5 = por %p2198_p0, %p2197_p1 }
 0x2e0   : > { %p2195_p13 = pneg %p2194_p11 }
 0x2e1   : > { %p2201_p10 = por %p2200_p6, %p2199_p5 }
 0x2e3   : > { %p2202_p12 = pnand %p2201_p10, %p2195_p13 }
 0x2e5   : > { %2205 = shalt.err (!%p2202_p12)
}
 0x2e6   : > { %s2254_s8 = smov 128  }
 0x2e7   : > { %2097 = dma.vmem_to_hbm [thread:$0]  (%p2878_p9), %s2813_s10, 256, %s2810_s30, %s2818_s11, %s2254_s8, %s2254_s8, %s2250_s15  }
 0x2e8 PF: > { %p2109_p2 = scmp.ge.s32.totalorder %s2244_s21, 2  ;;  %s1757_s22 = sand.u32 1, %s2232_s18  }
 0x2e9   : > { %p2879_p3 = scmp.ne.s32.totalorder %s2870_s29, 0  ;;  %s1758_s7 = scalar_lea.sflag [#allocation4], %s1757_s22 }
 0x2eb   : > { %p2104_p4 = pnand %p2109_p2, %p2879_p3 }
 0x2ed   : > { %2227 = dma.done.wait (!%p2104_p4), %s1758_s7, 256  }
 0x2ee   : > { %2229 = vsyncadd (!%p2104_p4), %s1758_s7, 4294967040  ;;  %p16_p7 = scmp.ge.s32.totalorder %s2310_s24, 4   ;;  %s2880_s18 = smov %s2236_s19 }
 0x2ef   : > { %s2881_s19 = smov %s2240_s20  ;;  %s2882_s20 = smov %s2321_s27 }
 0x2f0   : > { %s2883_s21 = smov %s2310_s24  ;;  %18 = sbr.rel (!%p16_p7) target bundleno = 4 (0x4), region = 82 }
 0x2f7   :  { %1763 = vsyncpa [#allocation3], 1 }
 0x2f8   :  { %1765 = vsyncpa [#allocation3 + $0x1], 1 }
 0x2f9   :  { %1766 = vsyncpa [#allocation4], 1 }
 0x2fa   :  { %1768 = vsyncpa [#allocation4 + $0x1], 1 }

</bundles_post_ra>
